<compile_context>
chip_gen: v6e
topology: v6e:2x2x1
jax: 0.10.0
libtpu: 0.0.40
codegen_flags: <defaults>
</compile_context>

<pallas_src>
import functools

import jax
import jax.numpy as jnp
from jax.experimental import pallas as pl
from jax.experimental.pallas import tpu as pltpu


def _round_up(x, m):
    return (x + m - 1) // m * m


def _basic_linear_kernel(x_ref, w1_ref, shift_ref, w2_ref, o_ref):
    # fc1 with folded bias + BN scale: (tb, dim1) @ (dim1, dim2) on the MXU,
    # bf16 (or f32) inputs, f32 accumulation.
    h = jnp.dot(x_ref[...], w1_ref[...], preferred_element_type=jnp.float32)
    # Folded (fc1 bias + BatchNorm eval shift), then ReLU.
    h = jnp.maximum(h + shift_ref[...], 0.0)
    # Dropout(0.5) -> identity in eval mode.
    # fc2 (dim2 -> 1): VPU multiply + lane reduction instead of an N=1 matmul.
    o_ref[...] = jnp.sum(h * w2_ref[...], axis=-1,
                         keepdims=True).astype(o_ref.dtype)


@functools.partial(jax.jit, static_argnames=("block_b", "use_bf16"))
def basic_linear_forward(x, w1, b1, bn_scale, bn_shift, w2, b2, *,
                         block_b=512, use_bf16=True):
    B, dim1 = x.shape
    dim2 = w1.shape[1]

    # --- constant-fold fc1 bias + eval-mode BatchNorm into W1 and one shift ---
    scale = bn_scale.reshape(1, dim2).astype(jnp.float32)
    w1_folded = w1.astype(jnp.float32) * scale                       # (dim1, dim2)
    shift = (bn_shift.reshape(1, dim2).astype(jnp.float32)
             + b1.reshape(1, dim2).astype(jnp.float32) * scale)      # (1, dim2)
    w2_row = w2.reshape(1, dim2).astype(jnp.float32)                 # (1, dim2)

    mxu_dtype = jnp.bfloat16 if use_bf16 else jnp.float32
    sub = 16 if use_bf16 else 8          # sublane multiple for the x/out tiles

    x_k = x.astype(mxu_dtype)
    w1_k = w1_folded.astype(mxu_dtype)

    # Pick the batch tile: round to the sublane multiple, clamp to (padded) B.
    bb = max(sub, min(_round_up(block_b, sub), _round_up(B, sub)))
    Bp = _round_up(B, bb)
    if Bp != B:
        x_k = jnp.pad(x_k, ((0, Bp - B), (0, 0)))
    grid = (Bp // bb,)

    out = pl.pallas_call(
        _basic_linear_kernel,
        out_shape=jax.ShapeDtypeStruct((Bp, 1), jnp.float32),
        grid_spec=pltpu.PrefetchScalarGridSpec(
            num_scalar_prefetch=0,
            grid=grid,
            in_specs=[
                pl.BlockSpec((bb, dim1), lambda i: (i, 0)),   # x tile
                pl.BlockSpec((dim1, dim2), lambda i: (0, 0)),  # folded W1 (full)
                pl.BlockSpec((1, dim2), lambda i: (0, 0)),     # folded shift
                pl.BlockSpec((1, dim2), lambda i: (0, 0)),     # W2 as a row
            ],
            out_specs=pl.BlockSpec((bb, 1), lambda i: (i, 0)),
        ),
        compiler_params=pltpu.CompilerParams(
            dimension_semantics=("parallel",),
            vmem_limit_bytes=32 * 1024 * 1024),
    )(x_k, w1_k, shift, w2_row)

    # fc2 bias: single scalar, added on the tiny (B, 1) output in the wrapper.
    out = out[:B] + b2.reshape(1, 1).astype(jnp.float32)
    return out.astype(x.dtype)


def init_params(key, dim1, dim2, dtype=jnp.float32):
    """PyTorch-style Linear init + non-trivial eval-mode BatchNorm1d stats."""
    k1, k2, k3, k4, k5, k6, k7, k8 = jax.random.split(key, 8)
    bound1 = 1.0 / jnp.sqrt(dim1)
    bound2 = 1.0 / jnp.sqrt(dim2)
    w1 = jax.random.uniform(k1, (dim1, dim2), dtype, -bound1, bound1)
    b1 = jax.random.uniform(k2, (1, dim2), dtype, -bound1, bound1)
    w2 = jax.random.uniform(k3, (dim2, 1), dtype, -bound2, bound2)
    b2 = jax.random.uniform(k4, (1, 1), dtype, -bound2, bound2)
    # BatchNorm1d(dim2), eval mode; non-trivial stats so the fold is exercised.
    eps = 1e-5
    gamma = 1.0 + 0.1 * jax.random.normal(k5, (1, dim2), dtype)
    beta = 0.1 * jax.random.normal(k6, (1, dim2), dtype)
    running_mean = 0.1 * jax.random.normal(k7, (1, dim2), dtype)
    running_var = jax.random.uniform(k8, (1, dim2), dtype, 0.5, 1.5)
    bn_scale = gamma / jnp.sqrt(running_var + eps)
    bn_shift = beta - running_mean * bn_scale
    return w1, b1, bn_scale, bn_shift, w2, b2


def reference_forward(x, w1, b1, bn_scale, bn_shift, w2, b2, *, use_bf16=True):
    """Unfused eval-mode reference (mirrors the kernel's MXU precision only)."""
    if use_bf16:
        h = jnp.dot(x.astype(jnp.bfloat16), w1.astype(jnp.bfloat16),
                    preferred_element_type=jnp.float32)
    else:
        h = jnp.dot(x, w1, preferred_element_type=jnp.float32)
    h = h + b1
    h = h * bn_scale + bn_shift          # BatchNorm1d (running stats)
    h = jnp.maximum(h, 0.0)              # ReLU; Dropout is identity in eval
    return (jnp.dot(h, w2) + b2).astype(x.dtype)


if __name__ == "__main__":
    # Small shapes consistent with the module: num_dim=64 -> dim1=128, dim2=128.
    # B=24 deliberately not a multiple of the tile to exercise the padding path.
    B, num_dim, dim2 = 24, 64, 128
    dim1 = num_dim * 2

    key = jax.random.PRNGKey(0)
    kx, kp = jax.random.split(key)
    x = jax.random.normal(kx, (B, dim1), jnp.float32)
    params = init_params(kp, dim1, dim2)

    # Fast path: bf16 MXU inputs, f32 accumulation.
    out_bf16 = jax.block_until_ready(
        basic_linear_forward(x, *params, block_b=512, use_bf16=True))
    ref_bf16 = reference_forward(x, *params, use_bf16=True)
    assert out_bf16.shape == (B, 1), out_bf16.shape
    assert jnp.allclose(out_bf16, ref_bf16, atol=1e-2, rtol=1e-2), (
        float(jnp.max(jnp.abs(out_bf16 - ref_bf16))))

    # Exact path: full f32 (tight check of the folded math / kernel plumbing).
    out_f32 = jax.block_until_ready(
        basic_linear_forward(x, *params, block_b=512, use_bf16=False))
    ref_f32 = reference_forward(x, *params, use_bf16=False)
    assert out_f32.shape == (B, 1), out_f32.shape
    assert jnp.allclose(out_f32, ref_f32, atol=1e-4, rtol=1e-4), (
        float(jnp.max(jnp.abs(out_f32 - ref_f32))))

    print("KERNEL_OK")
</pallas_src>

<mosaic_0001>
module attributes {stable_mosaic.version = 11 : i64} {
  func.func @_basic_linear_kernel(%arg0: i32, %arg1: memref<32x128xbf16, #tpu.memory_space<vmem>>, %arg2: memref<128x128xbf16, #tpu.memory_space<vmem>>, %arg3: memref<1x128xf32, #tpu.memory_space<vmem>>, %arg4: memref<1x128xf32, #tpu.memory_space<vmem>>, %arg5: memref<32x1xf32, #tpu.memory_space<vmem>>) attributes {dimension_semantics = [#tpu.dimension_semantics<parallel>], iteration_bounds = array<i64: 1>, scalar_prefetch = 0 : i64, scratch_operands = 0 : i64, tpu.core_type = #tpu.core_type<tc>, window_params = [{transform_indices = @transform_0, window_bounds = array<i64: 32, 128>}, {pipeline_mode = #tpu.pipeline_mode<synchronous>, transform_indices = @transform_1, window_bounds = array<i64: 128, 128>}, {pipeline_mode = #tpu.pipeline_mode<synchronous>, transform_indices = @transform_2, window_bounds = array<i64: 1, 128>}, {pipeline_mode = #tpu.pipeline_mode<synchronous>, transform_indices = @transform_3, window_bounds = array<i64: 1, 128>}, {transform_indices = @transform_4, window_bounds = array<i64: 32, 1>}]} {
    %c0 = arith.constant 0 : index
    %c0_0 = arith.constant 0 : index
    %0 = vector.load %arg1[%c0, %c0_0] : memref<32x128xbf16, #tpu.memory_space<vmem>>, vector<32x128xbf16>
    %c0_1 = arith.constant 0 : index
    %c0_2 = arith.constant 0 : index
    %1 = vector.load %arg2[%c0_1, %c0_2] : memref<128x128xbf16, #tpu.memory_space<vmem>>, vector<128x128xbf16>
    %cst = arith.constant dense<0.000000e+00> : vector<32x128xf32>
    %2 = tpu.matmul %0, %1, %cst {dimension_numbers = #tpu.dot_dimension_numbers<[1], [0], [0], [1], [0, 0, 1, 1], [], []>} : vector<32x128xbf16>, vector<128x128xbf16>, vector<32x128xf32> -> vector<32x128xf32>
    %c0_3 = arith.constant 0 : index
    %c0_4 = arith.constant 0 : index
    %3 = vector.load %arg3[%c0_3, %c0_4] : memref<1x128xf32, #tpu.memory_space<vmem>>, vector<1x128xf32>
    %4 = vector.broadcast %3 : vector<1x128xf32> to vector<32x128xf32>
    %5 = arith.addf %2, %4 : vector<32x128xf32>
    %cst_5 = arith.constant 0.000000e+00 : f32
    %6 = vector.broadcast %cst_5 : f32 to vector<32x128xf32>
    %7 = arith.maximumf %5, %6 : vector<32x128xf32>
    %c0_6 = arith.constant 0 : index
    %c0_7 = arith.constant 0 : index
    %8 = vector.load %arg4[%c0_6, %c0_7] : memref<1x128xf32, #tpu.memory_space<vmem>>, vector<1x128xf32>
    %9 = vector.broadcast %8 : vector<1x128xf32> to vector<32x128xf32>
    %10 = arith.mulf %7, %9 : vector<32x128xf32>
    %cst_8 = arith.constant dense<0.000000e+00> : vector<32xf32>
    %11 = vector.multi_reduction <add>, %10, %cst_8 [1] : vector<32x128xf32> to vector<32xf32>
    %12 = vector.shape_cast %11 : vector<32xf32> to vector<32x1xf32>
    %c0_9 = arith.constant 0 : index
    %c0_10 = arith.constant 0 : index
    %13 = vector.load %arg5[%c0_9, %c0_10] : memref<32x1xf32, #tpu.memory_space<vmem>>, vector<32x1xf32>
    tpu.vector_store %arg5[%c0_9, %c0_10], %12 {strides = array<i32>} : memref<32x1xf32, #tpu.memory_space<vmem>>, vector<32x1xf32>,
    return
  }
  func.func @transform_0(%arg0: i32) -> (i32, i32) {
    %c0_i32 = arith.constant 0 : i32
    %c0_i32_0 = arith.constant 0 : i32
    return %arg0, %c0_i32 : i32, i32
  }
  func.func @transform_1(%arg0: i32) -> (i32, i32) {
    %c0_i32 = arith.constant 0 : i32
    %c0_i32_0 = arith.constant 0 : i32
    %c0_i32_1 = arith.constant 0 : i32
    return %c0_i32, %c0_i32_0 : i32, i32
  }
  func.func @transform_2(%arg0: i32) -> (i32, i32) {
    %c0_i32 = arith.constant 0 : i32
    %c0_i32_0 = arith.constant 0 : i32
    %c0_i32_1 = arith.constant 0 : i32
    return %c0_i32, %c0_i32_0 : i32, i32
  }
  func.func @transform_3(%arg0: i32) -> (i32, i32) {
    %c0_i32 = arith.constant 0 : i32
    %c0_i32_0 = arith.constant 0 : i32
    %c0_i32_1 = arith.constant 0 : i32
    return %c0_i32, %c0_i32_0 : i32, i32
  }
  func.func @transform_4(%arg0: i32) -> (i32, i32) {
    %c0_i32 = arith.constant 0 : i32
    %c0_i32_0 = arith.constant 0 : i32
    return %arg0, %c0_i32 : i32, i32
  }
}

</mosaic_0001>

<bundles_post_ra>
// kernel: basic_linear_forward.1
= control target key start
LH: loop header
LB: loop body
LE: loop exit
PB: predicated region body
PF: predicated region fallthrough
CT: control target
= control target key end

     0   :  { %vm177_vm0 = vcmask 7168   ;;  %s311_s1 = inlined_call_operand.vmem [shape: bf16[128,128], index: 1, kind: input, shape index: {}]   ;;  %s312_s0 = inlined_call_operand.vmem [shape: bf16[32,128], index: 0, kind: input, shape index: {}]   ;;  %s313_s2 = inlined_call_operand.vmem [shape: f32[1,128], index: 2, kind: input, shape index: {}]   ;;  %s314_s3 = inlined_call_operand.vmem [shape: f32[1,128], index: 3, kind: input, shape index: {}]   ;;  %s315_s4 = inlined_call_operand.vmem [shape: f32[32,1], index: 4, kind: output, shape index: {}]  }
   0x1   :  { %v228_v0 = vld [vmem:[%s311_s1 + $0x38] sm:$0xff]   ;;  %v229_v1 = vld [vmem:[%s311_s1 + $0x30] sm:$0xff]   ;;  %v230_v2 = vld [vmem:[%s311_s1 + $0x28] sm:$0xff]  }
   0x2   :  { %208 = vmatprep.subr.bf16.mxu0 %v228_v0  ;;  %v231_v3 = vld [vmem:[%s311_s1 + $0x20] sm:$0xff]   ;;  %v232_v5 = vld [vmem:[%s311_s1 + $0x18] sm:$0xff]   ;;  %v233_v6 = vld [vmem:[%s311_s1 + $0x10] sm:$0xff]  }
   0x3   :  { %209 = vmatpush3.bf16.msra.mxu0 %v228_v0  ;;  %v236_v4 = vld [vmem:[%s312_s0] sm:$0xff]   ;;  %v234_v7 = vld [vmem:[%s311_s1 + $0x8] sm:$0xff]  }
   0x4   :  { %210 = vmatprep.subr.bf16.mxu0 %v229_v1  ;;  %224 = vmatprep.mubr.bf16.mxu0 %v236_v4  ;;  %v235_v8 = vld [vmem:[%s311_s1] sm:$0xff]   ;;  %v237_v9 = vld [vmem:[%s312_s0 + $0x8] sm:$0xff]  }
   0x5   :  { %v186_v10 = vld [vmem:[%s313_s2] ss:$0 sm:$0xff] }
   0x6   :  { %v197_v14 = vld [vmem:[%s314_s3] ss:$0 sm:$0xff] }
   0x7   :  { %211 = vmatpush3.bf16.msra.mxu0 %v229_v1 }
   0x8   :  { %212 = vmatprep.subr.bf16.mxu0 %v230_v2 }
   0xb   :  { %213 = vmatpush3.bf16.msra.mxu0 %v230_v2 }
   0xc   :  { %214 = vmatprep.subr.bf16.mxu0 %v231_v3 }
   0xf   :  { %215 = vmatpush3.bf16.msra.mxu0 %v231_v3 }
  0x10   :  { %216 = vmatprep.subr.bf16.mxu0 %v232_v5 }
  0x13   :  { %217 = vmatpush3.bf16.msra.mxu0 %v232_v5 }
  0x14   :  { %218 = vmatprep.subr.bf16.mxu0 %v233_v6 }
  0x17   :  { %219 = vmatpush3.bf16.msra.mxu0 %v233_v6 }
  0x18   :  { %220 = vmatprep.subr.bf16.mxu0 %v234_v7 }
  0x1b   :  { %221 = vmatpush3.bf16.msra.mxu0 %v234_v7 }
  0x1c   :  { %222 = vmatprep.subr.bf16.mxu0 %v235_v8 }
  0x1f   :  { %223 = vmatpush3.bf16.msra.mxu0 %v235_v8 }
  0x22   :  { %225 = vmatmul.mubr.bf16.vlgmr.msra.gmra.mxu0 %v237_v9 }
  0xe2   :  { %v226_v11 = vpop.f32.mrf.mxu0 }
  0xe3   :  { %v148_v12 = vadd.f32 %v226_v11, %v186_v10 }
  0xe4   :  { %v139_v13 = vpop.f32.mrf.mxu0 }
  0xe5   :  { %v156_v15 = vmax.f32 %v148_v12, 0.0  ;;  %v140_v16 = vadd.f32 %v186_v10, %v139_v13 }
  0xe6   :  { %v227_v17 = vpop.f32.mrf.mxu0 }
  0xe7   :  { %v154_v18 = vmax.f32 %v140_v16, 0.0  ;;  %v151_v19 = vadd.f32 %v227_v17, %v186_v10  ;;  %v167_v20 = vmul.f32 %v197_v14, %v156_v15 }
  0xe8   :  { %v142_v21 = vpop.f32.mrf.mxu0 }
  0xe9   :  { %v157_v22 = vmax.f32 %v151_v19, 0.0  ;;  %v143_v23 = vadd.f32 %v186_v10, %v142_v21  ;;  %173 = vadd.xlane.f32.xlu1 %v167_v20  ;;  %v165_v24 = vmul.f32 %v197_v14, %v154_v18 }
  0xeb   :  { %v155_v25 = vmax.f32 %v143_v23, 0.0  ;;  %169 = vadd.xlane.f32.xlu0 %v165_v24  ;;  %v168_v26 = vmul.f32 %v197_v14, %v157_v22 }
  0xed   :  { %175 = vadd.xlane.f32.xlu1 %v168_v26  ;;  %v166_v27 = vmul.f32 %v197_v14, %v155_v25 }
  0xef   :  { %171 = vadd.xlane.f32.xlu0 %v166_v27 }
 0x172   :  { %v174_v28 = vpop.xlane.xlu1 %173 }
 0x173   :  { %180 = vst.msk [vmem:[%s315_s4 + $0x10] sm:$0xff] %vm177_vm0, %v174_v28 }
 0x174   :  { %v170_v29 = vpop.xlane.xlu0 %169 }
 0x175   :  { %178 = vst.msk [vmem:[%s315_s4] sm:$0xff] %vm177_vm0, %v170_v29 }
 0x176   :  { %v176_v30 = vpop.xlane.xlu1 %175 }
 0x177   :  { %181 = vst.msk [vmem:[%s315_s4 + $0x18] sm:$0xff] %vm177_vm0, %v176_v30 }
 0x178   :  { %v172_v31 = vpop.xlane.xlu0 %171 }
 0x179   :  { %179 = vst.msk [vmem:[%s315_s4 + $0x8] sm:$0xff] %vm177_vm0, %v172_v31 }

</bundles_post_ra>
